<compile_context>
chip_gen: v6e
topology: v6e:2x2x1
jax: 0.10.0
libtpu: 0.0.40
codegen_flags: <defaults>
</compile_context>

<pallas_src>
import functools
import math

import jax
import jax.numpy as jnp
import numpy as np
from jax.experimental import pallas as pl
from jax.experimental.pallas import tpu as pltpu


# ------------------------------- Pallas kernel --------------------------------


def _layernorm(x, w, b, eps=1e-5):
    mu = jnp.mean(x, axis=-1, keepdims=True)
    var = jnp.mean((x - mu) ** 2, axis=-1, keepdims=True)   # biased, like torch
    return (x - mu) * jax.lax.rsqrt(var + eps) * w + b


def fused_encoder_kernel(
    x_ref,       # (rows, D)  f32  input activations (only read at layer 0)
    wqkv_ref,    # (D, 3D)    mm   fused q|k|v projection (x @ W form, head-major cols)
    bqkv_ref,    # (1, 3D)    f32
    wo_ref,      # (D, D)     mm   output projection (x @ W form, head-major rows)
    w1_ref,      # (D, F)     mm
    b1_ref,      # (1, F)     f32
    w2_ref,      # (F, D)     mm
    vec_ref,     # (6, D)     f32  rows: [bo, b2, ln1_w, ln1_b, ln2_w, ln2_b]
    o_ref,       # (rows, D)  f32  output -- doubles as the layer-resident activation slab
    *,
    nhead: int,
    seq_len: int,
    batch_block: int,
    matmul_dtype,
):
    layer = pl.program_id(1)
    mm = matmul_dtype

    @pl.when(layer == 0)
    def _():
        o_ref[...] = x_ref[...]          # seed the resident slab once

    x = o_ref[...].astype(jnp.float32)   # (R, D), resident across layers
    R, D = x.shape
    hd = D // nhead
    scale = 1.0 / math.sqrt(hd)

    vecs = vec_ref[...]                  # (6, D) f32

    # ---- multi-head self attention -------------------------------------------
    # Fused QKV projection: one full-width (R, D) @ (D, 3D) matmul.
    qkv = jnp.dot(x.astype(mm), wqkv_ref[...], preferred_element_type=jnp.float32)
    qkv = (qkv + bqkv_ref[...]).astype(mm)      # cast once; head slices reuse it

    def split_heads(col0):
        # (R, 3D) lane-dense slab -> (nhead*batch_block, S, hd).
        # Only static lane slices + major-dim reshapes/concat (no lane<->sublane
        # relayout, no per-batch Python loop).
        parts = [
            qkv[:, col0 + h * hd: col0 + (h + 1) * hd]
            .reshape(batch_block, seq_len, hd)
            for h in range(nhead)
        ]
        return jnp.concatenate(parts, axis=0)   # head-major leading order

    q = split_heads(0)
    k = split_heads(D)
    v = split_heads(2 * D)

    # Score / PV matmuls batched over nhead*batch_block in one einsum each.
    s = jnp.einsum("nqh,nkh->nqk", q, k,
                   preferred_element_type=jnp.float32) * scale        # (N, S, S) f32
    s = s - jnp.max(s, axis=-1, keepdims=True)
    p = jnp.exp(s)
    p = p * pl.reciprocal(jnp.sum(p, axis=-1, keepdims=True), approx=True)
    ctx = jnp.einsum("nqk,nkh->nqh", p.astype(mm), v,
                     preferred_element_type=jnp.float32)               # (N, S, hd)

    # Merge heads back lane-dense (R, D), then ONE output projection with K = D.
    ctx = jnp.concatenate(
        [ctx[h * batch_block:(h + 1) * batch_block].reshape(R, hd)
         for h in range(nhead)],
        axis=-1).astype(mm)                                            # (R, D)
    attn = jnp.dot(ctx, wo_ref[...],
                   preferred_element_type=jnp.float32) + vecs[0:1, :]  # + out-proj bias

    # ---- residual + LN1 (post-norm), FFN (relu), residual + LN2 --------------
    h1 = _layernorm(x + attn, vecs[2:3, :], vecs[3:4, :])
    ff = jnp.dot(h1.astype(mm), w1_ref[...],
                 preferred_element_type=jnp.float32) + b1_ref[...]
    ff = jnp.maximum(ff, 0.0)
    # TODO(synk): for large D/F on v7x (64 MiB VMEM), K-tile w1/w2 over F with an
    # inner loop / extra "arbitrary" grid axis instead of holding them whole.
    ff = jnp.dot(ff.astype(mm), w2_ref[...],
                 preferred_element_type=jnp.float32) + vecs[1:2, :]
    h2 = _layernorm(h1 + ff, vecs[4:5, :], vecs[5:6, :])

    o_ref[...] = h2.astype(o_ref.dtype)   # stays VMEM-resident for the next layer;
    #                                       written back to HBM only after the last layer.


# --------------------------------- wrapper -------------------------------------


def _default_vmem_limit():
    # Generation-aware: ~75% of physical VMEM (128 MiB on v5e/v6e, 64 MiB on v7x).
    try:
        cap = int(pltpu.get_tpu_info().vmem_capacity_bytes)
    except Exception:
        cap = 128 * 1024 * 1024
    return max(32 * 1024 * 1024, min(int(cap * 0.75), 112 * 1024 * 1024))


def transformer_encoder_pallas(src, packed, *, nhead, matmul_dtype=jnp.bfloat16,
                               batch_block=None, num_cores=1, vmem_limit_bytes=None):
    """src: (B, S, D) float32.  Runs the whole encoder stack in ONE pallas_call."""
    B, S, D = src.shape
    L = packed["wqkv"].shape[0]
    F = packed["w1"].shape[-1]

    if batch_block is None:
        # On v7x (2 TensorCores/chip) pass num_cores=2 so the "parallel" batch axis
        # spans both cores; on 1-TC chips nb=1 avoids re-streaming layer weights.
        if num_cores > 1 and B % num_cores == 0:
            batch_block = B // num_cores
        else:
            batch_block = B
    assert B % batch_block == 0
    nb = B // batch_block
    rows = batch_block * S

    if vmem_limit_bytes is None:
        vmem_limit_bytes = _default_vmem_limit()

    x2 = src.reshape(B * S, D)

    kernel = functools.partial(
        fused_encoder_kernel, nhead=nhead, seq_len=S,
        batch_block=batch_block, matmul_dtype=matmul_dtype)

    def layer_spec(shape):
        # One layer's tile per grid step; the layer axis ("arbitrary", innermost)
        # lets the pipeline prefetch layer l+1's weights while layer l computes.
        return pl.BlockSpec((None,) + shape, lambda b, l: (l,) + (0,) * len(shape))

    grid_spec = pltpu.PrefetchScalarGridSpec(
        num_scalar_prefetch=0,
        grid=(nb, L),
        in_specs=[
            pl.BlockSpec((rows, D), lambda b, l: (b, 0)),   # activations (read at l==0)
            layer_spec((D, 3 * D)),                         # wqkv (fused)
            layer_spec((1, 3 * D)),                         # bqkv
            layer_spec((D, D)),                             # wo
            layer_spec((D, F)),                             # w1
            layer_spec((1, F)),                             # b1
            layer_spec((F, D)),                             # w2
            layer_spec((6, D)),                             # [bo, b2, ln1w, ln1b, ln2w, ln2b]
        ],
        out_specs=pl.BlockSpec((rows, D), lambda b, l: (b, 0)),   # resident slab
        scratch_shapes=[],
    )

    out = pl.pallas_call(
        kernel,
        out_shape=jax.ShapeDtypeStruct((B * S, D), src.dtype),
        grid_spec=grid_spec,
        compiler_params=pltpu.CompilerParams(
            dimension_semantics=("parallel", "arbitrary"),
            vmem_limit_bytes=vmem_limit_bytes,
        ),
    )(x2, packed["wqkv"], packed["bqkv"], packed["wo"],
      packed["w1"], packed["b1"], packed["w2"], packed["vecs"])
    return out.reshape(B, S, D)


# ----------------------------- parameter handling ------------------------------


def init_layer_params(key, d_model, dim_feedforward):
    """Deterministic init mimicking nn.TransformerEncoderLayer shapes.

    Weights are stored pre-transposed as (in, out) so the math is x @ W."""
    ks = jax.random.split(key, 8)

    def xavier(k, shape):
        fan_in, fan_out = shape
        lim = math.sqrt(6.0 / (fan_in + fan_out))
        return jax.random.uniform(k, shape, jnp.float32, -lim, lim)

    D, F = d_model, dim_feedforward
    return {
        "wq": xavier(ks[0], (D, D)), "wk": xavier(ks[1], (D, D)), "wv": xavier(ks[2], (D, D)),
        "bq": jnp.zeros((1, D), jnp.float32),
        "bk": jnp.zeros((1, D), jnp.float32),
        "bv": jnp.zeros((1, D), jnp.float32),
        "wo": xavier(ks[3], (D, D)), "bo": jnp.zeros((1, D), jnp.float32),
        "w1": xavier(ks[4], (D, F)), "b1": 0.01 * jax.random.normal(ks[5], (1, F), jnp.float32),
        "w2": xavier(ks[6], (F, D)), "b2": 0.01 * jax.random.normal(ks[7], (1, D), jnp.float32),
        "ln1_w": jnp.ones((1, D), jnp.float32), "ln1_b": jnp.zeros((1, D), jnp.float32),
        "ln2_w": jnp.ones((1, D), jnp.float32), "ln2_b": jnp.zeros((1, D), jnp.float32),
    }


def pack_layer_params(layers, matmul_dtype):
    """Stack per-layer params along a leading layer axis and group them so the fused
    kernel streams exactly one layer's weights per grid step.

    wq|wk|wv are fused column-wise into a single (D, 3D) matrix (natural head-major
    column order).  MXU operands are stored in `matmul_dtype` (bf16 by default);
    biases / LayerNorm vectors stay f32."""
    wqkv, bqkv, wo, w1, b1, w2, vecs = [], [], [], [], [], [], []
    for p in layers:
        wqkv.append(jnp.concatenate([p["wq"], p["wk"], p["wv"]], axis=1))   # (D, 3D)
        bqkv.append(jnp.concatenate([p["bq"], p["bk"], p["bv"]], axis=1))   # (1, 3D)
        wo.append(p["wo"])
        w1.append(p["w1"])
        b1.append(p["b1"])
        w2.append(p["w2"])
        vecs.append(jnp.concatenate(
            [p["bo"], p["b2"], p["ln1_w"], p["ln1_b"], p["ln2_w"], p["ln2_b"]], axis=0))
    return {
        "wqkv": jnp.stack(wqkv).astype(matmul_dtype),   # (L, D, 3D)
        "bqkv": jnp.stack(bqkv).astype(jnp.float32),    # (L, 1, 3D)
        "wo":   jnp.stack(wo).astype(matmul_dtype),     # (L, D, D)
        "w1":   jnp.stack(w1).astype(matmul_dtype),     # (L, D, F)
        "b1":   jnp.stack(b1).astype(jnp.float32),      # (L, 1, F)
        "w2":   jnp.stack(w2).astype(matmul_dtype),     # (L, F, D)
        "vecs": jnp.stack(vecs).astype(jnp.float32),    # (L, 6, D)
    }


class TransformerEncoderPallas:
    """Mirror of the PyTorch TransformerEncoder module (eval mode).

    The PyTorch module permutes (batch, seq, d) -> (seq, batch, d) and back only
    because nn.TransformerEncoder defaults to batch_first=False; attention is
    computed independently per batch element, so operating batch-first directly
    is semantically identical."""

    def __init__(self, d_model, nhead, num_encoder_layers, dim_feedforward,
                 dropout=0.1, key=None, matmul_dtype=jnp.bfloat16, layers=None):
        assert d_model % nhead == 0
        self.d_model = d_model
        self.nhead = nhead
        self.matmul_dtype = matmul_dtype
        if layers is None:
            if key is None:
                key = jax.random.PRNGKey(42)
            keys = jax.random.split(key, num_encoder_layers)
            layers = [init_layer_params(k, d_model, dim_feedforward) for k in keys]
        self.layers = layers
        self.packed = pack_layer_params(layers, matmul_dtype)

    def __call__(self, src, batch_block=None, num_cores=1):
        return transformer_encoder_pallas(
            src, self.packed, nhead=self.nhead, matmul_dtype=self.matmul_dtype,
            batch_block=batch_block, num_cores=num_cores)


# ------------------------------ pure-JAX reference -----------------------------


def reference_layer(x, p, nhead):
    S, D = x.shape[1], x.shape[2]
    hd = D // nhead
    q = x @ p["wq"] + p["bq"]
    k = x @ p["wk"] + p["bk"]
    v = x @ p["wv"] + p["bv"]
    q = q.reshape(-1, S, nhead, hd).transpose(0, 2, 1, 3)
    k = k.reshape(-1, S, nhead, hd).transpose(0, 2, 1, 3)
    v = v.reshape(-1, S, nhead, hd).transpose(0, 2, 1, 3)
    scores = jnp.einsum("bhqd,bhkd->bhqk", q, k) / math.sqrt(hd)
    w = jax.nn.softmax(scores, axis=-1)
    attn = jnp.einsum("bhqk,bhkd->bhqd", w, v).transpose(0, 2, 1, 3).reshape(-1, S, D)
    attn = attn @ p["wo"] + p["bo"]

    def ln(y, wgt, b):
        mu = y.mean(-1, keepdims=True)
        var = ((y - mu) ** 2).mean(-1, keepdims=True)
        return (y - mu) / jnp.sqrt(var + 1e-5) * wgt + b

    h1 = ln(x + attn, p["ln1_w"], p["ln1_b"])
    ff = jax.nn.relu(h1 @ p["w1"] + p["b1"]) @ p["w2"] + p["b2"]
    return ln(h1 + ff, p["ln2_w"], p["ln2_b"])


# -------------------------------------- main -----------------------------------

if __name__ == "__main__":
    batch, seq, d_model = 2, 8, 32
    nhead, num_layers, dim_ff = 4, 2, 64

    model = TransformerEncoderPallas(d_model, nhead, num_layers, dim_ff,
                                     key=jax.random.PRNGKey(42),
                                     matmul_dtype=jnp.bfloat16)

    src = jax.random.normal(jax.random.PRNGKey(0), (batch, seq, d_model), jnp.float32)

    out = jax.block_until_ready(model(src))
    assert out.shape == (batch, seq, d_model)

    # pure-JAX f32 reference matching the PyTorch forward semantics
    ref = src
    for p in model.layers:
        ref = reference_layer(ref, p, nhead)
    ref = np.asarray(jax.block_until_ready(ref))

    # Tolerance: bf16 MXU operands and the approx softmax reciprocal introduce
    # ~1e-2-level deviation; 5e-2 still catches any structural bug (wrong packing /
    # head split / LN), which would produce O(0.1+) errors.
    np.testing.assert_allclose(np.asarray(out), ref, rtol=5e-2, atol=5e-2)

    # Also exercise the f32-matmul configuration (same params, same kernel).
    model_f32 = TransformerEncoderPallas(d_model, nhead, num_layers, dim_ff,
                                         matmul_dtype=jnp.float32,
                                         layers=model.layers)
    out_f32 = jax.block_until_ready(model_f32(src))
    np.testing.assert_allclose(np.asarray(out_f32), ref, rtol=5e-2, atol=5e-2)

    print("KERNEL_OK")
</pallas_src>

<mosaic_0001>
module attributes {stable_mosaic.version = 11 : i64} {
  func.func @fused_encoder_kernel(%arg0: i32, %arg1: i32, %arg2: memref<16x32xf32, #tpu.memory_space<vmem>>, %arg3: memref<1x32x96xbf16, #tpu.memory_space<vmem>>, %arg4: memref<1x1x96xf32, #tpu.memory_space<vmem>>, %arg5: memref<1x32x32xbf16, #tpu.memory_space<vmem>>, %arg6: memref<1x32x64xbf16, #tpu.memory_space<vmem>>, %arg7: memref<1x1x64xf32, #tpu.memory_space<vmem>>, %arg8: memref<1x64x32xbf16, #tpu.memory_space<vmem>>, %arg9: memref<1x6x32xf32, #tpu.memory_space<vmem>>, %arg10: memref<16x32xf32, #tpu.memory_space<vmem>>) attributes {dimension_semantics = [#tpu.dimension_semantics<parallel>, #tpu.dimension_semantics<arbitrary>], iteration_bounds = array<i64: 1, 2>, scalar_prefetch = 0 : i64, scratch_operands = 0 : i64, tpu.core_type = #tpu.core_type<tc>, window_params = [{transform_indices = @transform_0, window_bounds = array<i64: 16, 32>}, {transform_indices = @transform_1, window_bounds = array<i64: 1, 32, 96>}, {transform_indices = @transform_2, window_bounds = array<i64: 1, 1, 96>}, {transform_indices = @transform_3, window_bounds = array<i64: 1, 32, 32>}, {transform_indices = @transform_4, window_bounds = array<i64: 1, 32, 64>}, {transform_indices = @transform_5, window_bounds = array<i64: 1, 1, 64>}, {transform_indices = @transform_6, window_bounds = array<i64: 1, 64, 32>}, {transform_indices = @transform_7, window_bounds = array<i64: 1, 6, 32>}, {transform_indices = @transform_8, window_bounds = array<i64: 16, 32>}]} {
    %c0_i32 = arith.constant 0 : i32
    %0 = arith.cmpi eq, %arg1, %c0_i32 : i32
    %1 = arith.extui %0 : i1 to i32
    %c0_i32_0 = arith.constant 0 : i32
    %2 = arith.cmpi ne, %1, %c0_i32_0 : i32
    scf.if %2 {
      %c0_44 = arith.constant 0 : index
      %c0_45 = arith.constant 0 : index
      %141 = vector.load %arg2[%c0_44, %c0_45] : memref<16x32xf32, #tpu.memory_space<vmem>>, vector<16x32xf32>
      %c0_46 = arith.constant 0 : index
      %c0_47 = arith.constant 0 : index
      %142 = vector.load %arg10[%c0_46, %c0_47] : memref<16x32xf32, #tpu.memory_space<vmem>>, vector<16x32xf32>
      tpu.vector_store %arg10[%c0_46, %c0_47], %141 {strides = array<i32>} : memref<16x32xf32, #tpu.memory_space<vmem>>, vector<16x32xf32>,
    } else {
    }
    %c0 = arith.constant 0 : index
    %c0_1 = arith.constant 0 : index
    %3 = vector.load %arg10[%c0, %c0_1] : memref<16x32xf32, #tpu.memory_space<vmem>>, vector<16x32xf32>
    %c0_2 = arith.constant 0 : index
    %c0_3 = arith.constant 0 : index
    %c0_4 = arith.constant 0 : index
    %4 = vector.load %arg9[%c0_2, %c0_3, %c0_4] : memref<1x6x32xf32, #tpu.memory_space<vmem>>, vector<1x6x32xf32>
    %5 = vector.shape_cast %4 : vector<1x6x32xf32> to vector<6x32xf32>
    %6 = arith.truncf %3 : vector<16x32xf32> to vector<16x32xbf16>
    %c0_5 = arith.constant 0 : index
    %c0_6 = arith.constant 0 : index
    %c0_7 = arith.constant 0 : index
    %7 = vector.load %arg3[%c0_5, %c0_6, %c0_7] : memref<1x32x96xbf16, #tpu.memory_space<vmem>>, vector<1x32x96xbf16>
    %8 = vector.shape_cast %7 : vector<1x32x96xbf16> to vector<32x96xbf16>
    %cst = arith.constant dense<0.000000e+00> : vector<16x96xf32>
    %9 = tpu.matmul %6, %8, %cst {dimension_numbers = #tpu.dot_dimension_numbers<[1], [0], [0], [1], [0, 0, 1, 1], [], []>} : vector<16x32xbf16>, vector<32x96xbf16>, vector<16x96xf32> -> vector<16x96xf32>
    %c0_8 = arith.constant 0 : index
    %c0_9 = arith.constant 0 : index
    %c0_10 = arith.constant 0 : index
    %10 = vector.load %arg4[%c0_8, %c0_9, %c0_10] : memref<1x1x96xf32, #tpu.memory_space<vmem>>, vector<1x1x96xf32>
    %11 = vector.shape_cast %10 : vector<1x1x96xf32> to vector<1x96xf32>
    %12 = vector.broadcast %11 : vector<1x96xf32> to vector<16x96xf32>
    %13 = arith.addf %9, %12 : vector<16x96xf32>
    %14 = arith.truncf %13 : vector<16x96xf32> to vector<16x96xbf16>
    %15 = vector.extract_strided_slice %14 {offsets = [0, 0], sizes = [16, 8], strides = [1, 1]} : vector<16x96xbf16> to vector<16x8xbf16>
    %16 = vector.shape_cast %15 : vector<16x8xbf16> to vector<2x8x8xbf16>
    %17 = vector.extract_strided_slice %14 {offsets = [0, 8], sizes = [16, 8], strides = [1, 1]} : vector<16x96xbf16> to vector<16x8xbf16>
    %18 = vector.shape_cast %17 : vector<16x8xbf16> to vector<2x8x8xbf16>
    %19 = vector.extract_strided_slice %14 {offsets = [0, 16], sizes = [16, 8], strides = [1, 1]} : vector<16x96xbf16> to vector<16x8xbf16>
    %20 = vector.shape_cast %19 : vector<16x8xbf16> to vector<2x8x8xbf16>
    %21 = vector.extract_strided_slice %14 {offsets = [0, 24], sizes = [16, 8], strides = [1, 1]} : vector<16x96xbf16> to vector<16x8xbf16>
    %22 = vector.shape_cast %21 : vector<16x8xbf16> to vector<2x8x8xbf16>
    %23 = tpu.concatenate %16, %18, %20, %22 in 0 : vector<2x8x8xbf16>, vector<2x8x8xbf16>, vector<2x8x8xbf16>, vector<2x8x8xbf16> -> vector<8x8x8xbf16>
    %24 = vector.extract_strided_slice %14 {offsets = [0, 32], sizes = [16, 8], strides = [1, 1]} : vector<16x96xbf16> to vector<16x8xbf16>
    %25 = vector.shape_cast %24 : vector<16x8xbf16> to vector<2x8x8xbf16>
    %26 = vector.extract_strided_slice %14 {offsets = [0, 40], sizes = [16, 8], strides = [1, 1]} : vector<16x96xbf16> to vector<16x8xbf16>
    %27 = vector.shape_cast %26 : vector<16x8xbf16> to vector<2x8x8xbf16>
    %28 = vector.extract_strided_slice %14 {offsets = [0, 48], sizes = [16, 8], strides = [1, 1]} : vector<16x96xbf16> to vector<16x8xbf16>
    %29 = vector.shape_cast %28 : vector<16x8xbf16> to vector<2x8x8xbf16>
    %30 = vector.extract_strided_slice %14 {offsets = [0, 56], sizes = [16, 8], strides = [1, 1]} : vector<16x96xbf16> to vector<16x8xbf16>
    %31 = vector.shape_cast %30 : vector<16x8xbf16> to vector<2x8x8xbf16>
    %32 = tpu.concatenate %25, %27, %29, %31 in 0 : vector<2x8x8xbf16>, vector<2x8x8xbf16>, vector<2x8x8xbf16>, vector<2x8x8xbf16> -> vector<8x8x8xbf16>
    %33 = vector.extract_strided_slice %14 {offsets = [0, 64], sizes = [16, 8], strides = [1, 1]} : vector<16x96xbf16> to vector<16x8xbf16>
    %34 = vector.shape_cast %33 : vector<16x8xbf16> to vector<2x8x8xbf16>
    %35 = vector.extract_strided_slice %14 {offsets = [0, 72], sizes = [16, 8], strides = [1, 1]} : vector<16x96xbf16> to vector<16x8xbf16>
    %36 = vector.shape_cast %35 : vector<16x8xbf16> to vector<2x8x8xbf16>
    %37 = vector.extract_strided_slice %14 {offsets = [0, 80], sizes = [16, 8], strides = [1, 1]} : vector<16x96xbf16> to vector<16x8xbf16>
    %38 = vector.shape_cast %37 : vector<16x8xbf16> to vector<2x8x8xbf16>
    %39 = vector.extract_strided_slice %14 {offsets = [0, 88], sizes = [16, 8], strides = [1, 1]} : vector<16x96xbf16> to vector<16x8xbf16>
    %40 = vector.shape_cast %39 : vector<16x8xbf16> to vector<2x8x8xbf16>
    %41 = tpu.concatenate %34, %36, %38, %40 in 0 : vector<2x8x8xbf16>, vector<2x8x8xbf16>, vector<2x8x8xbf16>, vector<2x8x8xbf16> -> vector<8x8x8xbf16>
    "tpu.trace_start"() <{level = 10 : i32, message = "nqh,nkh->nqk"}> : () -> ()
    %cst_11 = arith.constant dense<0.000000e+00> : vector<8x8x8xf32>
    %42 = tpu.matmul %23, %32, %cst_11 {dimension_numbers = #tpu.dot_dimension_numbers<[2], [2], [1], [1], [0, 0, 0, 1, 1, 1], [0], [0]>} : vector<8x8x8xbf16>, vector<8x8x8xbf16>, vector<8x8x8xf32> -> vector<8x8x8xf32>
    "tpu.trace_stop"() : () -> ()
    %cst_12 = arith.constant 0.353553385 : f32
    %43 = vector.broadcast %cst_12 : f32 to vector<8x8x8xf32>
    %44 = arith.mulf %42, %43 : vector<8x8x8xf32>
    %cst_13 = arith.constant dense<0xFF800000> : vector<8x8xf32>
    %45 = vector.multi_reduction <maximumf>, %44, %cst_13 [2] : vector<8x8x8xf32> to vector<8x8xf32>
    %46 = vector.shape_cast %45 : vector<8x8xf32> to vector<8x8x1xf32>
    %47 = vector.broadcast %46 : vector<8x8x1xf32> to vector<8x8x8xf32>
    %48 = arith.subf %44, %47 : vector<8x8x8xf32>
    %49 = math.exp %48 : vector<8x8x8xf32>
    %cst_14 = arith.constant dense<0.000000e+00> : vector<8x8xf32>
    %50 = vector.multi_reduction <add>, %49, %cst_14 [2] : vector<8x8x8xf32> to vector<8x8xf32>
    %51 = vector.shape_cast %50 : vector<8x8xf32> to vector<8x8x1xf32>
    %52 = tpu.reciprocal %51 {approx = true} : vector<8x8x1xf32> -> vector<8x8x1xf32>
    %53 = vector.broadcast %52 : vector<8x8x1xf32> to vector<8x8x8xf32>
    %54 = arith.mulf %49, %53 : vector<8x8x8xf32>
    %55 = arith.truncf %54 : vector<8x8x8xf32> to vector<8x8x8xbf16>
    "tpu.trace_start"() <{level = 10 : i32, message = "nqk,nkh->nqh"}> : () -> ()
    %cst_15 = arith.constant dense<0.000000e+00> : vector<8x8x8xf32>
    %56 = tpu.matmul %55, %41, %cst_15 {dimension_numbers = #tpu.dot_dimension_numbers<[2], [1], [1], [2], [0, 0, 0, 1, 1, 2], [0], [0]>} : vector<8x8x8xbf16>, vector<8x8x8xbf16>, vector<8x8x8xf32> -> vector<8x8x8xf32>
    "tpu.trace_stop"() : () -> ()
    %57 = vector.extract_strided_slice %56 {offsets = [0, 0, 0], sizes = [2, 8, 8], strides = [1, 1, 1]} : vector<8x8x8xf32> to vector<2x8x8xf32>
    %58 = vector.shape_cast %57 : vector<2x8x8xf32> to vector<16x8xf32>
    %59 = vector.extract_strided_slice %56 {offsets = [2, 0, 0], sizes = [2, 8, 8], strides = [1, 1, 1]} : vector<8x8x8xf32> to vector<2x8x8xf32>
    %60 = vector.shape_cast %59 : vector<2x8x8xf32> to vector<16x8xf32>
    %61 = vector.extract_strided_slice %56 {offsets = [4, 0, 0], sizes = [2, 8, 8], strides = [1, 1, 1]} : vector<8x8x8xf32> to vector<2x8x8xf32>
    %62 = vector.shape_cast %61 : vector<2x8x8xf32> to vector<16x8xf32>
    %63 = vector.extract_strided_slice %56 {offsets = [6, 0, 0], sizes = [2, 8, 8], strides = [1, 1, 1]} : vector<8x8x8xf32> to vector<2x8x8xf32>
    %64 = vector.shape_cast %63 : vector<2x8x8xf32> to vector<16x8xf32>
    %65 = tpu.concatenate %58, %60, %62, %64 in 1 : vector<16x8xf32>, vector<16x8xf32>, vector<16x8xf32>, vector<16x8xf32> -> vector<16x32xf32>
    %66 = arith.truncf %65 : vector<16x32xf32> to vector<16x32xbf16>
    %c0_16 = arith.constant 0 : index
    %c0_17 = arith.constant 0 : index
    %c0_18 = arith.constant 0 : index
    %67 = vector.load %arg5[%c0_16, %c0_17, %c0_18] : memref<1x32x32xbf16, #tpu.memory_space<vmem>>, vector<1x32x32xbf16>
    %68 = vector.shape_cast %67 : vector<1x32x32xbf16> to vector<32x32xbf16>
    %cst_19 = arith.constant dense<0.000000e+00> : vector<16x32xf32>
    %69 = tpu.matmul %66, %68, %cst_19 {dimension_numbers = #tpu.dot_dimension_numbers<[1], [0], [0], [1], [0, 0, 1, 1], [], []>} : vector<16x32xbf16>, vector<32x32xbf16>, vector<16x32xf32> -> vector<16x32xf32>
    %70 = vector.extract_strided_slice %5 {offsets = [0, 0], sizes = [1, 32], strides = [1, 1]} : vector<6x32xf32> to vector<1x32xf32>
    %71 = vector.broadcast %70 : vector<1x32xf32> to vector<16x32xf32>
    %72 = arith.addf %69, %71 : vector<16x32xf32>
    %73 = arith.addf %3, %72 : vector<16x32xf32>
    %74 = vector.extract_strided_slice %5 {offsets = [2, 0], sizes = [1, 32], strides = [1, 1]} : vector<6x32xf32> to vector<1x32xf32>
    %75 = vector.extract_strided_slice %5 {offsets = [3, 0], sizes = [1, 32], strides = [1, 1]} : vector<6x32xf32> to vector<1x32xf32>
    %cst_20 = arith.constant dense<0.000000e+00> : vector<16xf32>
    %76 = vector.multi_reduction <add>, %73, %cst_20 [1] : vector<16x32xf32> to vector<16xf32>
    %77 = vector.shape_cast %76 : vector<16xf32> to vector<16x1xf32>
    %cst_21 = arith.constant 3.200000e+01 : f32
    %78 = vector.broadcast %cst_21 : f32 to vector<16x1xf32>
    %79 = arith.divf %77, %78 : vector<16x1xf32>
    %80 = vector.broadcast %79 : vector<16x1xf32> to vector<16x32xf32>
    %81 = arith.subf %73, %80 : vector<16x32xf32>
    %82 = arith.mulf %81, %81 : vector<16x32xf32>
    %cst_22 = arith.constant dense<0.000000e+00> : vector<16xf32>
    %83 = vector.multi_reduction <add>, %82, %cst_22 [1] : vector<16x32xf32> to vector<16xf32>
    %84 = vector.shape_cast %83 : vector<16xf32> to vector<16x1xf32>
    %cst_23 = arith.constant 3.200000e+01 : f32
    %85 = vector.broadcast %cst_23 : f32 to vector<16x1xf32>
    %86 = arith.divf %84, %85 : vector<16x1xf32>
    %87 = vector.broadcast %79 : vector<16x1xf32> to vector<16x32xf32>
    %88 = arith.subf %73, %87 : vector<16x32xf32>
    %cst_24 = arith.constant 9.99999974E-6 : f32
    %89 = vector.broadcast %cst_24 : f32 to vector<16x1xf32>
    %90 = arith.addf %86, %89 : vector<16x1xf32>
    %91 = math.rsqrt %90 : vector<16x1xf32>
    %92 = vector.broadcast %91 : vector<16x1xf32> to vector<16x32xf32>
    %93 = arith.mulf %88, %92 : vector<16x32xf32>
    %94 = vector.broadcast %74 : vector<1x32xf32> to vector<16x32xf32>
    %95 = arith.mulf %93, %94 : vector<16x32xf32>
    %96 = vector.broadcast %75 : vector<1x32xf32> to vector<16x32xf32>
    %97 = arith.addf %95, %96 : vector<16x32xf32>
    %98 = arith.truncf %97 : vector<16x32xf32> to vector<16x32xbf16>
    %c0_25 = arith.constant 0 : index
    %c0_26 = arith.constant 0 : index
    %c0_27 = arith.constant 0 : index
    %99 = vector.load %arg6[%c0_25, %c0_26, %c0_27] : memref<1x32x64xbf16, #tpu.memory_space<vmem>>, vector<1x32x64xbf16>
    %100 = vector.shape_cast %99 : vector<1x32x64xbf16> to vector<32x64xbf16>
    %cst_28 = arith.constant dense<0.000000e+00> : vector<16x64xf32>
    %101 = tpu.matmul %98, %100, %cst_28 {dimension_numbers = #tpu.dot_dimension_numbers<[1], [0], [0], [1], [0, 0, 1, 1], [], []>} : vector<16x32xbf16>, vector<32x64xbf16>, vector<16x64xf32> -> vector<16x64xf32>
    %c0_29 = arith.constant 0 : index
    %c0_30 = arith.constant 0 : index
    %c0_31 = arith.constant 0 : index
    %102 = vector.load %arg7[%c0_29, %c0_30, %c0_31] : memref<1x1x64xf32, #tpu.memory_space<vmem>>, vector<1x1x64xf32>
    %103 = vector.shape_cast %102 : vector<1x1x64xf32> to vector<1x64xf32>
    %104 = vector.broadcast %103 : vector<1x64xf32> to vector<16x64xf32>
    %105 = arith.addf %101, %104 : vector<16x64xf32>
    %cst_32 = arith.constant 0.000000e+00 : f32
    %106 = vector.broadcast %cst_32 : f32 to vector<16x64xf32>
    %107 = arith.maximumf %105, %106 : vector<16x64xf32>
    %108 = arith.truncf %107 : vector<16x64xf32> to vector<16x64xbf16>
    %c0_33 = arith.constant 0 : index
    %c0_34 = arith.constant 0 : index
    %c0_35 = arith.constant 0 : index
    %109 = vector.load %arg8[%c0_33, %c0_34, %c0_35] : memref<1x64x32xbf16, #tpu.memory_space<vmem>>, vector<1x64x32xbf16>
    %110 = vector.shape_cast %109 : vector<1x64x32xbf16> to vector<64x32xbf16>
    %cst_36 = arith.constant dense<0.000000e+00> : vector<16x32xf32>
    %111 = tpu.matmul %108, %110, %cst_36 {dimension_numbers = #tpu.dot_dimension_numbers<[1], [0], [0], [1], [0, 0, 1, 1], [], []>} : vector<16x64xbf16>, vector<64x32xbf16>, vector<16x32xf32> -> vector<16x32xf32>
    %112 = vector.extract_strided_slice %5 {offsets = [1, 0], sizes = [1, 32], strides = [1, 1]} : vector<6x32xf32> to vector<1x32xf32>
    %113 = vector.broadcast %112 : vector<1x32xf32> to vector<16x32xf32>
    %114 = arith.addf %111, %113 : vector<16x32xf32>
    %115 = arith.addf %97, %114 : vector<16x32xf32>
    %116 = vector.extract_strided_slice %5 {offsets = [4, 0], sizes = [1, 32], strides = [1, 1]} : vector<6x32xf32> to vector<1x32xf32>
    %117 = vector.extract_strided_slice %5 {offsets = [5, 0], sizes = [1, 32], strides = [1, 1]} : vector<6x32xf32> to vector<1x32xf32>
    %cst_37 = arith.constant dense<0.000000e+00> : vector<16xf32>
    %118 = vector.multi_reduction <add>, %115, %cst_37 [1] : vector<16x32xf32> to vector<16xf32>
    %119 = vector.shape_cast %118 : vector<16xf32> to vector<16x1xf32>
    %cst_38 = arith.constant 3.200000e+01 : f32
    %120 = vector.broadcast %cst_38 : f32 to vector<16x1xf32>
    %121 = arith.divf %119, %120 : vector<16x1xf32>
    %122 = vector.broadcast %121 : vector<16x1xf32> to vector<16x32xf32>
    %123 = arith.subf %115, %122 : vector<16x32xf32>
    %124 = arith.mulf %123, %123 : vector<16x32xf32>
    %cst_39 = arith.constant dense<0.000000e+00> : vector<16xf32>
    %125 = vector.multi_reduction <add>, %124, %cst_39 [1] : vector<16x32xf32> to vector<16xf32>
    %126 = vector.shape_cast %125 : vector<16xf32> to vector<16x1xf32>
    %cst_40 = arith.constant 3.200000e+01 : f32
    %127 = vector.broadcast %cst_40 : f32 to vector<16x1xf32>
    %128 = arith.divf %126, %127 : vector<16x1xf32>
    %129 = vector.broadcast %121 : vector<16x1xf32> to vector<16x32xf32>
    %130 = arith.subf %115, %129 : vector<16x32xf32>
    %cst_41 = arith.constant 9.99999974E-6 : f32
    %131 = vector.broadcast %cst_41 : f32 to vector<16x1xf32>
    %132 = arith.addf %128, %131 : vector<16x1xf32>
    %133 = math.rsqrt %132 : vector<16x1xf32>
    %134 = vector.broadcast %133 : vector<16x1xf32> to vector<16x32xf32>
    %135 = arith.mulf %130, %134 : vector<16x32xf32>
    %136 = vector.broadcast %116 : vector<1x32xf32> to vector<16x32xf32>
    %137 = arith.mulf %135, %136 : vector<16x32xf32>
    %138 = vector.broadcast %117 : vector<1x32xf32> to vector<16x32xf32>
    %139 = arith.addf %137, %138 : vector<16x32xf32>
    %c0_42 = arith.constant 0 : index
    %c0_43 = arith.constant 0 : index
    %140 = vector.load %arg10[%c0_42, %c0_43] : memref<16x32xf32, #tpu.memory_space<vmem>>, vector<16x32xf32>
    tpu.vector_store %arg10[%c0_42, %c0_43], %139 {strides = array<i32>} : memref<16x32xf32, #tpu.memory_space<vmem>>, vector<16x32xf32>,
    return
  }
  func.func @transform_0(%arg0: i32, %arg1: i32) -> (i32, i32) {
    %c0_i32 = arith.constant 0 : i32
    %c0_i32_0 = arith.constant 0 : i32
    return %arg0, %c0_i32 : i32, i32
  }
  func.func @transform_1(%arg0: i32, %arg1: i32) -> (i32, i32, i32) {
    %c0_i32 = arith.constant 0 : i32
    %c0_i32_0 = arith.constant 0 : i32
    %c0_i32_1 = arith.constant 0 : i32
    return %arg1, %c0_i32, %c0_i32_0 : i32, i32, i32
  }
  func.func @transform_2(%arg0: i32, %arg1: i32) -> (i32, i32, i32) {
    %c0_i32 = arith.constant 0 : i32
    %c0_i32_0 = arith.constant 0 : i32
    %c0_i32_1 = arith.constant 0 : i32
    return %arg1, %c0_i32, %c0_i32_0 : i32, i32, i32
  }
  func.func @transform_3(%arg0: i32, %arg1: i32) -> (i32, i32, i32) {
    %c0_i32 = arith.constant 0 : i32
    %c0_i32_0 = arith.constant 0 : i32
    %c0_i32_1 = arith.constant 0 : i32
    return %arg1, %c0_i32, %c0_i32_0 : i32, i32, i32
  }
  func.func @transform_4(%arg0: i32, %arg1: i32) -> (i32, i32, i32) {
    %c0_i32 = arith.constant 0 : i32
    %c0_i32_0 = arith.constant 0 : i32
    %c0_i32_1 = arith.constant 0 : i32
    return %arg1, %c0_i32, %c0_i32_0 : i32, i32, i32
  }
  func.func @transform_5(%arg0: i32, %arg1: i32) -> (i32, i32, i32) {
    %c0_i32 = arith.constant 0 : i32
    %c0_i32_0 = arith.constant 0 : i32
    %c0_i32_1 = arith.constant 0 : i32
    return %arg1, %c0_i32, %c0_i32_0 : i32, i32, i32
  }
  func.func @transform_6(%arg0: i32, %arg1: i32) -> (i32, i32, i32) {
    %c0_i32 = arith.constant 0 : i32
    %c0_i32_0 = arith.constant 0 : i32
    %c0_i32_1 = arith.constant 0 : i32
    return %arg1, %c0_i32, %c0_i32_0 : i32, i32, i32
  }
  func.func @transform_7(%arg0: i32, %arg1: i32) -> (i32, i32, i32) {
    %c0_i32 = arith.constant 0 : i32
    %c0_i32_0 = arith.constant 0 : i32
    %c0_i32_1 = arith.constant 0 : i32
    return %arg1, %c0_i32, %c0_i32_0 : i32, i32, i32
  }
  func.func @transform_8(%arg0: i32, %arg1: i32) -> (i32, i32) {
    %c0_i32 = arith.constant 0 : i32
    %c0_i32_0 = arith.constant 0 : i32
    return %arg0, %c0_i32 : i32, i32
  }
}

</mosaic_0001>

<bundles_post_ra>
// kernel: tpu_custom_call.1
= control target key start
LH: loop header
LB: loop body
LE: loop exit
PB: predicated region body
PF: predicated region fallthrough
CT: control target
= control target key end

     0   :  { %13 = vsyncpa [#allocation3], 0  ;;  %s2760_s0 = inlined_call_operand.hbm [shape: f32[16,32], index: 0, kind: input, shape index: {}]   ;;  %s2761_s1 = inlined_call_operand.vmem [shape: bf16[2,32,96], index: 1, kind: input, shape index: {}]   ;;  %s2762_s2 = inlined_call_operand.vmem [shape: f32[2,1,96], index: 2, kind: input, shape index: {}]   ;;  %s2763_s3 = inlined_call_operand.vmem [shape: bf16[2,32,32], index: 3, kind: input, shape index: {}]   ;;  %s2764_s4 = inlined_call_operand.vmem [shape: bf16[2,32,64], index: 4, kind: input, shape index: {}]   ;;  %s2765_s5 = inlined_call_operand.vmem [shape: f32[2,1,64], index: 5, kind: input, shape index: {}]   ;;  %s2766_s6 = inlined_call_operand.vmem [shape: bf16[2,64,32], index: 6, kind: input, shape index: {}]   ;;  %s2767_s7 = inlined_call_operand.vmem [shape: f32[2,6,32], index: 7, kind: input, shape index: {}]   ;;  %s2768_s8 = inlined_call_operand.hbm [shape: f32[16,32], index: 8, kind: output, shape index: {}]  }
   0x1   :  { %14 = vsyncpa [#allocation4], 0  ;;  %s2405_s27 = smov 0   ;;  %s2407_s28 = smov 0  }
   0x2   :  { %s2409_s29 = smov 0  }
   0x3 LB: > { %s2769_s30 = sadd.s32 4294967295, %s2343_s29   ;;  %s29_s9 = sadd.s32 1, %s2339_s28  ;;  %s2343_s29 = sphi %s2409_s29, %s20_s29   ;;  %s2339_s28 = sphi %s2407_s28, %s2776_s28   ;;  %s2335_s27 = sphi %s2405_s27, %s2775_s27  }
   0x4   : > { %p30_p0 = scmp.ge.s32.totalorder %s29_s9, 2  ;;  %p1900_p1 = scmp.ge.s32.totalorder %s2343_s29, 1 }
   0x5   : > { %p271_p2 = scmp.lt.s32.totalorder %s2343_s29, 3  ;;  %p2432_p4 = scmp.eq.s32.totalorder %s2769_s30, 0 }
   0x6   : > { %s2778_s9 = smov (%p30_p0, %s29_s9), 0  ;;  %s2345_s12 = smov [#allocation2]  }
   0x7   : > { %p2426_p3 = pnand %p1900_p1, %p271_p2  ;;  %s286_s13 = sshll.u32 %s2345_s12, 4  ;;  %s287_s13 = int_to_ptr.vmem [resolvable:$true] %s286_s13 }
   0x8   : > { %s2274_s14 = scalar_lea.vmem %s287_s13, 256  ;;  %p2282_p11 = scmp.lt.s32.totalorder %s287_s13, %s287_s13 }
   0x9   : > { %p2151_p5 = pneg %p2426_p3  ;;  %p2275_p8 = scmp.ne.s32.totalorder %s287_s13, %s2274_s14 }
   0xa   : > { %p2283_p12 = scmp.lt.s32.totalorder %s2274_s14, %s2274_s14 }
   0xb   : > { %p2152_p6 = pnand %p2432_p4, %p2151_p5 }
   0xc   : > { %p2284_p13 = por %p2283_p12, %p2282_p11 }
   0xd   : > { %p2265_p7 = pneg %p2152_p6 }
   0xf   : > { %p2277_p9 = pnand %p2275_p8, %p2265_p7 }
  0x11   : > { %p2278_p10 = pneg %p2277_p9 }
  0x13   : > { %p2285_p0 = pnand %p2284_p13, %p2278_p10 }
  0x15   : > { %2288 = shalt.err (!%p2285_p0)
}
  0x16   : > { %s2346_s15 = smov 128   ;;  %s2347_s16 = smov 8  }
  0x17   : > { %2154 = dma.hbm_to_vmem [thread:$0]  (!%p2152_p6), %s2760_s0, 256, %s287_s13, [#allocation3], %s2346_s15, %s2346_s15, %s2347_s16  }
  0x18   : > { %353 = sbr.rel (%p2426_p3) target bundleno = 2610 (0xa32), region = 52 }
  0x1d   : > { %2326 = dma.done.wait (%p2432_p4), [#allocation3], 256  }
  0x1e   : > { %2328 = vsyncadd (%p2432_p4), [#allocation3], 4294967040  ;;  %p408_p1 = scmp.lt.s32.totalorder %s2335_s27, 1  ;;  %p1914_p2 = scmp.ne.s32.totalorder %s2335_s27, 0 }
  0x20   : > { %s2451_s19 = scalar_select %p408_p1, %s2335_s27, 1 }
  0x22   : > { %s1959_s20 = sshll.u32 %s2451_s19, 4  ;;  %s428_s18 = scalar_lea.vmem %s2765_s5, %s2451_s19 }
  0x23   : > { %s412_s26 = scalar_lea.vmem %s2761_s1, %s1959_s20  ;;  %s2464_s12 = scalar_lea.vmem %s2763_s3, %s1959_s20 }
  0x24   : > { %s2469_s15 = scalar_lea.vmem %s2764_s4, %s1959_s20  ;;  %s1962_s21 = sshll.u32 %s2451_s19, 5 }
  0x25   : > { %s1913_s22 = sshll.u32 %s2451_s19, 3  ;;  %s2480_s24 = scalar_lea.vmem %s2766_s6, %s1962_s21 }
  0x26   : > { %s2485_s11 = scalar_lea.vmem %s2767_s7, %s1913_s22  ;;  %443 = sbr.rel (%p1914_p2) target bundleno = 45 (0x2d), region = 60 }
  0x2b   : > { %v444_v0 = vld [vmem:[#allocation2] sm:$0xff]  ;;  %vm446_vm0 = vcmask 261120   ;;  %v445_v1 = vld [vmem:[#allocation2 + $0x8] sm:$0xff] }
  0x2c   : > { %447 = vst.msk [vmem:[#allocation5] sm:$0xff] %vm446_vm0, %v444_v0  ;;  %448 = vst.msk [vmem:[#allocation5 + $0x8] sm:$0xff] %vm446_vm0, %v445_v1 }
  0x2d PF: > { %v2213_v2 = vld [vmem:[%s412_s26 + $0x8] sm:$0xff]   ;;  %v2348_v3 = vmov 0.0   ;;  %v2214_v4 = vld [vmem:[%s412_s26] sm:$0xff]   ;;  %vm2349_vm1 = vmmov 0   ;;  %vm476_vm2 = vcmask 261120   ;;  %s2772_s20 = scalar_lea.vmem %s2762_s2, %s2451_s19  ;;  %s2350_s23 = smov 112  }
  0x2e   : > { %2011 = vmatprep.subr.bf16.mxu0 %v2348_v3  ;;  %2019 = vmatprep.subr.bf16.mxu1 %v2348_v3  ;;  %v1915_v8 = vld [vmem:[%s2772_s20] ss:$0 sm:$0xff]  ;;  %s2351_s26 = smov 120   ;;  %s2352_s13 = smov 104   ;;  %vm541_vm3 = vcmask 64512   ;;  %vm1045_vm4 = vcmask 1043456  }
  0x2f   : > { %2012 = vmatpush3.bf16.msra.mxu0 %v2213_v2  ;;  %2015 = vmatprep.mubr.msk.bf16.mxu0 %vm2349_vm1, %v2348_v3  ;;  %s2353_s14 = smov 96   ;;  %s2354_s16 = smov 64   ;;  %vm1451_vm5 = vcmask 130048   ;;  %vm1454_vm6 = vcmask 195584   ;;  %vm1670_vm7 = vcmask 523264  }
  0x30   : > { %2013 = vmatprep.subr.bf16.mxu0 %v2348_v3  ;;  %2021 = vmatprep.mubr.msk.bf16.mxu1 %vm2349_vm1, %v2348_v3  ;;  %s2355_s17 = smov 8   ;;  %s2356_s21 = smov 16  }
  0x31   : > { %s2357_s22 = smov 24   ;;  %s2358_s19 = smov [#allocation5]  }
  0x33   : > { %v2492_v5 = vld [vmem:[#allocation5] sm:$0xff]  ;;  %v2494_v6 = vld [vmem:[#allocation5 + $0x8] sm:$0xff]  ;;  %2014 = vmatpush3.bf16.msra.mxu0 %v2214_v4 }
  0x34   : > { %v452_v7 = vpack.c.bf16 %v2494_v6, %v2492_v5  ;;  %2025 = vmatprep.subr.bf16.mxu0 %v2348_v3 }
  0x36   : > { %2016 = vmatmul.mubr.msk.bf16.vlgmr.msra.gmra.mxu0 %vm476_vm2, %v452_v7 }
  0x37   : > { %2027 = vmatprep.mubr.msk.bf16.mxu0 %vm2349_vm1, %v2348_v3 }
  0xf6   : > { %v514_v9 = vpop.f32.mrf.mxu0 }
  0xf7   : > { %v515_v10 = vadd.f32 %v1915_v8, %v514_v9 }
  0xf8   : > { %v2017_v11 = vpop.f32.mrf.mxu0 }
  0xf9   : > { %v1963_v12 = vpack.c.bf16 %v515_v10, %v515_v10 }
  0xfa   : > { %v517_v13 = vpop.f32.mrf.mxu0 }
  0xfb   : > { %v518_v14 = vadd.f32 %v1915_v8, %v517_v13  ;;  %531 = vrot.lane.b32.xlu1 %v1963_v12, %s2350_s23  ;;  %527 = vrot.lane.b32.xlu0 %v1963_v12, %s2351_s26 }
  0xfc   : > { %v2018_v15 = vpop.f32.mrf.mxu0 }
  0xfd   : > { %v2510_v16 = vpack.c.bf16 %v518_v14, %v518_v14 }
  0xff   : > { %533 = vrot.lane.b32.xlu1 %v2510_v16, %s2350_s23  ;;  %529 = vrot.lane.b32.xlu0 %v2510_v16, %s2351_s26 }
 0x103   : > { %537 = vrot.lane.b32.xlu1 %v2510_v16, %s2352_s13  ;;  %535 = vrot.lane.b32.xlu0 %v1963_v12, %s2352_s13 }
 0x107   : > { %588 = vrot.lane.b32.xlu1 %v2510_v16, %s2353_s14  ;;  %539 = vrot.lane.b32.xlu0 %v1963_v12, %s2353_s14 }
 0x16d   : > { %v532_v17 = vpop.permute.xlu1 %531  ;;  %v528_v18 = vpop.permute.xlu0 %527 }
 0x16e   : > { %v2516_v19 = vcombine.low %v528_v18, %v528_v18  ;;  %v2519_v22 = vcombine.low %v532_v17, %v532_v17 }
 0x170   : > { %638 = vrot.lane.b32.xlu0 %v2516_v19, %s2353_s14 }
 0x171   : > { %v534_v20 = vpop.permute.xlu1 %533  ;;  %v530_v21 = vpop.permute.xlu0 %529 }
 0x172   : > { %v2521_v23 = vcombine.low %v530_v21, %v530_v21  ;;  %v2525_v26 = vcombine.low %v534_v20, %v534_v20 }
 0x174   : > { %738 = vrot.lane.b32.xlu0 %v2519_v22, %s2353_s14  ;;  %688 = vrot.lane.b32.xlu1 %v2521_v23, %s2353_s14 }
 0x175   : > { %v538_v24 = vpop.permute.xlu1 %537  ;;  %v536_v25 = vpop.permute.xlu0 %535 }
 0x176   : > { %v2527_v27 = vcombine.low %v536_v25, %v536_v25  ;;  %v2531_v30 = vcombine.low %v538_v24, %v538_v24 }
 0x178   : > { %788 = vrot.lane.b32.xlu1 %v2525_v26, %s2353_s14  ;;  %838 = vrot.lane.b32.xlu0 %v2527_v27, %s2353_s14 }
 0x179   : > { %v589_v28 = vpop.permute.xlu1 %588  ;;  %v540_v29 = vpop.permute.xlu0 %539 }
 0x17a   : > { %v594_v31 = vsel %vm541_vm3, %v589_v28, 0  ;;  %v546_v32 = vsel %vm541_vm3, %v540_v29, 0 }
 0x17b   : > { %2020 = vmatpush3.bf16.xpose.msra.mxu1 %v546_v32  ;;  %2026 = vmatpush3.bf16.xpose.msra.mxu0 %v594_v31 }
 0x17c   : > { %888 = vrot.lane.b32.xlu1 %v2531_v30, %s2353_s14  ;;  %2031 = vmatprep.subr.bf16.mxu1 %v2348_v3 }
 0x17d   : > { %2037 = vmatprep.subr.bf16.mxu0 %v2348_v3 }
 0x180   : > { %1040 = vrot.lane.b32.xlu1 %v1963_v12, %s2354_s16 }
 0x182   : > { %2022 = vmatmul.mubr.msk.bf16.vlgmr.msra.gmra.mxu1 %vm541_vm3, %v1963_v12  ;;  %2028 = vmatmul.mubr.msk.bf16.vlgmr.msra.gmra.mxu0 %vm541_vm3, %v2510_v16 }
 0x183   : > { %2033 = vmatprep.mubr.msk.bf16.mxu1 %vm2349_vm1, %v2348_v3  ;;  %2039 = vmatprep.mubr.msk.bf16.mxu0 %vm2349_vm1, %v2348_v3 }
 0x1e2   : > { %v639_v33 = vpop.permute.xlu0 %638 }
 0x1e3   : > { %v644_v34 = vsel %vm541_vm3, %v639_v33, 0 }
 0x1e4   : > { %2032 = vmatpush3.bf16.xpose.msra.mxu1 %v644_v34 }
 0x1e5   : > { %2043 = vmatprep.subr.bf16.mxu1 %v2348_v3 }
 0x1e6   : > { %v689_v35 = vpop.permute.xlu1 %688  ;;  %v739_v37 = vpop.permute.xlu0 %738 }
 0x1e7   : > { %v694_v36 = vsel %vm541_vm3, %v689_v35, 0  ;;  %v744_v38 = vsel %vm541_vm3, %v739_v37, 0 }
 0x1e8   : > { %2038 = vmatpush3.bf16.xpose.msra.mxu0 %v694_v36 }
 0x1e9   : > { %2049 = vmatprep.subr.bf16.mxu0 %v2348_v3 }
 0x1ea   : > { %v789_v39 = vpop.permute.xlu1 %788  ;;  %v839_v41 = vpop.permute.xlu0 %838 }
 0x1eb   : > { %2034 = vmatmul.mubr.msk.bf16.vlgmr.msra.gmra.mxu1 %vm541_vm3, %v528_v18  ;;  %v794_v40 = vsel %vm541_vm3, %v789_v39, 0  ;;  %v844_v43 = vsel %vm541_vm3, %v839_v41, 0 }
 0x1ec   : > { %2044 = vmatpush3.bf16.xpose.msra.mxu1 %v744_v38  ;;  %2045 = vmatprep.mubr.msk.bf16.mxu1 %vm2349_vm1, %v2348_v3 }
 0x1ed   : > { %2055 = vmatprep.subr.bf16.mxu1 %v2348_v3 }
 0x1ee   : > { %v889_v42 = vpop.permute.xlu1 %888 }
 0x1ef   : > { %2040 = vmatmul.mubr.msk.bf16.vlgmr.msra.gmra.mxu0 %vm541_vm3, %v530_v21  ;;  %v894_v44 = vsel %vm541_vm3, %v889_v42, 0 }
 0x1f0   : > { %2050 = vmatpush3.bf16.xpose.msra.mxu0 %v794_v40  ;;  %2051 = vmatprep.mubr.msk.bf16.mxu0 %vm2349_vm1, %v2348_v3 }
 0x1f1   : > { %2061 = vmatprep.subr.bf16.mxu0 %v2348_v3 }
 0x1f2   : > { %v1041_v45 = vpop.permute.xlu1 %1040 }
 0x1f3   : > { %2046 = vmatmul.mubr.msk.bf16.vlgmr.msra.gmra.mxu1 %vm541_vm3, %v532_v17  ;;  %v1047_v46 = vsel %vm1045_vm4, %v1041_v45, 0 }
 0x1f4   : > { %2056 = vmatpush3.bf16.xpose.msra.mxu1 %v844_v43  ;;  %2057 = vmatprep.mubr.msk.bf16.mxu1 %vm2349_vm1, %v2348_v3 }
 0x1f5   : > { %2067 = vmatprep.subr.bf16.mxu1 %v2348_v3 }
 0x1f7   : > { %2052 = vmatmul.mubr.msk.bf16.vlgmr.msra.gmra.mxu0 %vm541_vm3, %v534_v20 }
 0x1f8   : > { %2062 = vmatpush3.bf16.xpose.msra.mxu0 %v894_v44  ;;  %2063 = vmatprep.mubr.msk.bf16.mxu0 %vm2349_vm1, %v2348_v3 }
 0x1f9   : > { %2073 = vmatprep.subr.bf16.mxu0 %v2348_v3 }
 0x1fb   : > { %2058 = vmatmul.mubr.msk.bf16.vlgmr.msra.gmra.mxu1 %vm541_vm3, %v536_v25 }
 0x1fc   : > { %2068 = vmatpush3.bf16.msra.mxu1 %v1047_v46  ;;  %2069 = vmatprep.mubr.msk.bf16.mxu1 %vm2349_vm1, %v2348_v3 }
 0x1fd   : > { %2079 = vmatprep.subr.bf16.mxu1 %v2348_v3 }
 0x1ff   : > { %2064 = vmatmul.mubr.msk.bf16.vlgmr.msra.gmra.mxu0 %vm541_vm3, %v538_v24 }
 0x200   : > { %2075 = vmatprep.mubr.msk.bf16.mxu0 %vm2349_vm1, %v2348_v3 }
 0x242   : > { %v582_v47 = vpop.f32.mrf.mxu1  ;;  %v630_v48 = vpop.f32.mrf.mxu0 }
 0x243   : > { %v936_v49 = vmul.f32 0.35355338, %v582_v47  ;;  %v937_v50 = vmul.f32 0.35355338, %v630_v48 }
 0x244   : > { %v2023_v51 = vpop.f32.mrf.mxu1  ;;  %v2029_v52 = vpop.f32.mrf.mxu0 }
 0x245   : > { %v944_v53 = vsel %vm541_vm3, %v936_v49, -inf  ;;  %v947_v54 = vsel %vm541_vm3, %v937_v50, -inf }
 0x246   : > { %945 = vmax.xlane.f32.xlu0 %v944_v53  ;;  %v585_v55 = vpop.f32.mrf.mxu1  ;;  %948 = vmax.xlane.f32.xlu1 %v947_v54  ;;  %v633_v56 = vpop.f32.mrf.mxu0 }
 0x248   : > { %v2024_v57 = vpop.f32.mrf.mxu1  ;;  %v2030_v58 = vpop.f32.mrf.mxu0 }
 0x2ab   : > { %v680_v59 = vpop.f32.mrf.mxu1 }
 0x2ac   : > { %v938_v60 = vmul.f32 0.35355338, %v680_v59 }
 0x2ad   : > { %v2035_v61 = vpop.f32.mrf.mxu1 }
 0x2ae   : > { %v950_v62 = vsel %vm541_vm3, %v938_v60, -inf }
 0x2af   : > { %951 = vmax.xlane.f32.xlu0 %v950_v62  ;;  %v683_v63 = vpop.f32.mrf.mxu1  ;;  %v730_v0 = vpop.f32.mrf.mxu0 }
 0x2b0   : > { %v939_v1 = vmul.f32 0.35355338, %v730_v0 }
 0x2b1   : > { %v2036_v2 = vpop.f32.mrf.mxu1  ;;  %v2041_v4 = vpop.f32.mrf.mxu0 }
 0x2b2   : > { %v953_v7 = vsel %vm541_vm3, %v939_v1, -inf }
 0x2b3   : > { %v780_v8 = vpop.f32.mrf.mxu1  ;;  %954 = vmax.xlane.f32.xlu0 %v953_v7  ;;  %v733_v9 = vpop.f32.mrf.mxu0 }
 0x2b4   : > { %v2582_v10 = vmul.f32 0.35355338, %v780_v8 }
 0x2b5   : > { %v2042_v11 = vpop.f32.mrf.mxu0  ;;  %v2047_v12 = vpop.f32.mrf.mxu1 }
 0x2b6   : > { %v956_v13 = vsel %vm541_vm3, %v2582_v10, -inf }
 0x2b7   : > { %v783_v14 = vpop.f32.mrf.mxu1  ;;  %957 = vmax.xlane.f32.xlu1 %v956_v13  ;;  %v830_v15 = vpop.f32.mrf.mxu0 }
 0x2b8   : > { %v2586_v17 = vmul.f32 0.35355338, %v830_v15 }
 0x2b9   : > { %v2048_v18 = vpop.f32.mrf.mxu1  ;;  %v2053_v20 = vpop.f32.mrf.mxu0 }
 0x2ba   : > { %v959_v21 = vsel %vm541_vm3, %v2586_v17, -inf }
 0x2bb   : > { %v880_v24 = vpop.f32.mrf.mxu1  ;;  %960 = vmax.xlane.f32.xlu0 %v959_v21  ;;  %v833_v25 = vpop.f32.mrf.mxu0 }
 0x2bc   : > { %v942_v28 = vmul.f32 0.35355338, %v880_v24 }
 0x2bd   : > { %v2054_v29 = vpop.f32.mrf.mxu0  ;;  %v2059_v31 = vpop.f32.mrf.mxu1 }
 0x2be   : > { %v962_v32 = vsel %vm541_vm3, %v942_v28, -inf }
 0x2bf   : > { %v883_v33 = vpop.f32.mrf.mxu1  ;;  %963 = vmax.xlane.f32.xlu1 %v962_v32  ;;  %v930_v34 = vpop.f32.mrf.mxu0 }
 0x2c0   : > { %v943_v35 = vmul.f32 0.35355338, %v930_v34 }
 0x2c1   : > { %v2060_v36 = vpop.f32.mrf.mxu1  ;;  %v2065_v37 = vpop.f32.mrf.mxu0 }
 0x2c2   : > { %v965_v38 = vsel %vm541_vm3, %v943_v35, -inf }
 0x2c3   : > { %966 = vmax.xlane.f32.xlu0 %v965_v38  ;;  %v933_v39 = vpop.f32.mrf.mxu0 }
 0x2c5   : > { %v2066_v40 = vpop.f32.mrf.mxu0 }
 0x2cf   : > { %v946_v41 = vpop.xlane.xlu0 %945  ;;  %v949_v42 = vpop.xlane.xlu1 %948 }
 0x2d0   : > { %1137 = vrot.lane.b32.xlu1 %v2516_v19, %s2354_s16  ;;  %v968_v43 = vsub.f32 %v936_v49, %v946_v41  ;;  %v969_v44 = vsub.f32 %v937_v50, %v949_v42 }
 0x2d2   : > { %v976_v45 = vmul.f32 1.442695, %v968_v43  ;;  %v978_v46 = vmul.f32 1.442695, %v969_v44 }
 0x2d4   : > { %1185 = vrot.lane.b32.xlu1 %v2521_v23, %s2354_s16  ;;  %2223 = vpow2.f32 %v976_v45 }
 0x2d5   : > { %2225 = vpow2.f32 %v978_v46 }
 0x2d9   : > { %1089 = vrot.lane.b32.xlu0 %v2510_v16, %s2354_s16 }
 0x2e1   : > { %v2224_v47 = vpop.eup %2223 }
 0x2e2   : > { %v2226_v48 = vpop.eup %2225  ;;  %v992_v51 = vsel %vm541_vm3, %v2224_v47, 0.0 }
 0x2e3   : > { %v995_v19 = vsel %vm541_vm3, %v2226_v48, 0.0 }
 0x2f8   : > { %993 = vadd.xlane.f32.xlu1 %v992_v51  ;;  %996 = vadd.xlane.f32.xlu0 %v995_v19 }
 0x338   : > { %v952_v23 = vpop.xlane.xlu0 %951 }
 0x339   : > { %v970_v52 = vsub.f32 %v938_v60, %v952_v23 }
 0x33b   : > { %v980_v53 = vmul.f32 1.442695, %v970_v52 }
 0x33c   : > { %v955_v16 = vpop.xlane.xlu0 %954 }
 0x33d   : > { %2227 = vpow2.f32 %v980_v53  ;;  %v971_v54 = vsub.f32 %v939_v1, %v955_v16 }
 0x33f   : > { %v982_v49 = vmul.f32 1.442695, %v971_v54 }
 0x340   : > { %v958_v62 = vpop.xlane.xlu1 %957 }
 0x341   : > { %2229 = vpow2.f32 %v982_v49  ;;  %v972_v63 = vsub.f32 %v2582_v10, %v958_v62 }
 0x343   : > { %v984_v2 = vmul.f32 1.442695, %v972_v63 }
 0x344   : > { %v961_v50 = vpop.xlane.xlu0 %960 }
 0x345   : > { %v973_v1 = vsub.f32 %v2586_v17, %v961_v50  ;;  %2231 = vpow2.f32 %v984_v2 }
 0x347   : > { %v986_v7 = vmul.f32 1.442695, %v973_v1 }
 0x348   : > { %v964_v0 = vpop.xlane.xlu1 %963 }
 0x349   : > { %v974_v4 = vsub.f32 %v942_v28, %v964_v0  ;;  %2233 = vpow2.f32 %v986_v7 }
 0x34a   : > { %v2600_v55 = vpop.eup %2227 }
 0x34b   : > { %v998_v56 = vsel %vm541_vm3, %v2600_v55, 0.0  ;;  %v988_v8 = vmul.f32 1.442695, %v974_v4 }
 0x34c   : > { %999 = vadd.xlane.f32.xlu1 %v998_v56  ;;  %v967_v57 = vpop.xlane.xlu0 %966  ;;  %v1138_v12 = vpop.permute.xlu1 %1137 }
 0x34d   : > { %v975_v9 = vsub.f32 %v943_v35, %v967_v57  ;;  %2235 = vpow2.f32 %v988_v8  ;;  %v1143_v34 = vsel %vm1045_vm4, %v1138_v12, 0 }
 0x34e   : > { %v2604_v58 = vpop.eup %2229 }
 0x34f   : > { %v1001_v59 = vsel %vm541_vm3, %v2604_v58, 0.0  ;;  %v990_v11 = vmul.f32 1.442695, %v975_v9 }
 0x350   : > { %1002 = vadd.xlane.f32.xlu0 %v1001_v59  ;;  %v1090_v60 = vpop.permute.xlu0 %1089  ;;  %v1186_v13 = vpop.permute.xlu1 %1185 }
 0x351   : > { %v1095_v61 = vsel %vm1045_vm4, %v1090_v60, 0  ;;  %2237 = vpow2.f32 %v990_v11  ;;  %v1191_v35 = vsel %vm1045_vm4, %v1186_v13, 0 }
 0x352   : > { %2074 = vmatpush3.bf16.msra.mxu0 %v1095_v61 }
 0x353   : > { %2085 = vmatprep.subr.bf16.mxu0 %v2348_v3 }
 0x35d   : > { %1281 = vrot.lane.b32.xlu1 %v2525_v26, %s2354_s16  ;;  %v2616_v26 = vpop.eup %2231 }
 0x35e   : > { %v1004_v10 = vsel %vm541_vm3, %v2616_v26, 0.0 }
 0x366   : > { %1233 = vrot.lane.b32.xlu0 %v2519_v22, %s2354_s16  ;;  %v2618_v22 = vpop.eup %2233 }
 0x367   : > { %v2622_v14 = vpop.eup %2235  ;;  %v1007_v20 = vsel %vm541_vm3, %v2618_v22, 0.0 }
 0x368   : > { %v1010_v18 = vsel %vm541_vm3, %v2622_v14, 0.0  ;;  %v2628_v21 = vpop.eup %2237 }
 0x369   : > { %v1013_v24 = vsel %vm541_vm3, %v2628_v21, 0.0 }
 0x381   : > { %1005 = vadd.xlane.f32.xlu1 %v1004_v10  ;;  %v994_v15 = vpop.xlane.xlu1 %993  ;;  %v997_v17 = vpop.xlane.xlu0 %996 }
 0x382   : > { %2239 = vrcp.f32 %v994_v15 }
 0x383   : > { %2241 = vrcp.f32 %v997_v17 }
 0x385   : > { %1011 = vadd.xlane.f32.xlu1 %v1010_v18  ;;  %1008 = vadd.xlane.f32.xlu0 %v1007_v20  ;;  %v2215_v18 = vld [vmem:[%s2464_s12 + $0x8] sm:$0xff]  }
 0x389   : > { %1014 = vadd.xlane.f32.xlu0 %v1013_v24 }
 0x38f   : > { %v2240_v25 = vpop.eup %2239 }
 0x390   : > { %v2242_v28 = vpop.eup %2241  ;;  %v1024_v29 = vmul.f32 %v2240_v25, %v2224_v47  ;;  %v2216_v25 = vld [vmem:[%s2464_s12] sm:$0xff]  }
 0x391   : > { %v1025_v31 = vmul.f32 %v2242_v28, %v2226_v48 }
 0x392   : > { %v1032_v32 = vpack.c.bf16 %v1024_v29, %v1024_v29 }
 0x393   : > { %v1033_v33 = vpack.c.bf16 %v1025_v31, %v1025_v31 }
 0x394   : > { %2070 = vmatmul.mubr.msk.bf16.vlgmr.msra.gmra.mxu1 %vm541_vm3, %v1032_v32 }
 0x395   : > { %2076 = vmatmul.mubr.msk.bf16.vlgmr.msra.gmra.mxu0 %vm541_vm3, %v1033_v33  ;;  %2080 = vmatpush3.bf16.msra.mxu1 %v1143_v34 }
 0x396   : > { %2086 = vmatpush3.bf16.msra.mxu0 %v1191_v35  ;;  %1377 = vrot.lane.b32.xlu1 %v2531_v30, %s2354_s16 }
 0x397   : > { %2081 = vmatprep.mubr.msk.bf16.mxu1 %vm2349_vm1, %v2348_v3  ;;  %2091 = vmatprep.subr.bf16.mxu1 %v2348_v3 }
 0x398   : > { %2087 = vmatprep.mubr.msk.bf16.mxu0 %vm2349_vm1, %v2348_v3  ;;  %2097 = vmatprep.subr.bf16.mxu0 %v2348_v3 }
 0x39f   : > { %1329 = vrot.lane.b32.xlu0 %v2527_v27, %s2354_s16 }
 0x3d5   : > { %v1000_v36 = vpop.xlane.xlu1 %999 }
 0x3d6   : > { %2243 = vrcp.f32 %v1000_v36 }
 0x3d9   : > { %v1003_v37 = vpop.xlane.xlu0 %1002  ;;  %v1282_v44 = vpop.permute.xlu1 %1281 }
 0x3da   : > { %2245 = vrcp.f32 %v1003_v37  ;;  %v1287_v45 = vsel %vm1045_vm4, %v1282_v44, 0 }
 0x3dd   : > { %v1234_v39 = vpop.permute.xlu0 %1233 }
 0x3de   : > { %v1239_v42 = vsel %vm1045_vm4, %v1234_v39, 0 }
 0x3e3   : > { %v2244_v38 = vpop.eup %2243 }
 0x3e4   : > { %v1026_v30 = vmul.f32 %v2244_v38, %v2600_v55 }
 0x3e6   : > { %v1034_v40 = vpack.c.bf16 %v1026_v30, %v1026_v30 }
 0x3e7   : > { %v2246_v41 = vpop.eup %2245 }
 0x3e8   : > { %2082 = vmatmul.mubr.msk.bf16.vlgmr.msra.gmra.mxu1 %vm541_vm3, %v1034_v40  ;;  %v1027_v43 = vmul.f32 %v2246_v41, %v2604_v58 }
 0x3e9   : > { %2092 = vmatpush3.bf16.msra.mxu1 %v1239_v42  ;;  %2093 = vmatprep.mubr.msk.bf16.mxu1 %vm2349_vm1, %v2348_v3 }
 0x3ea   : > { %v1035_v27 = vpack.c.bf16 %v1027_v43, %v1027_v43  ;;  %2103 = vmatprep.subr.bf16.mxu1 %v2348_v3 }
 0x3ec   : > { %2088 = vmatmul.mubr.msk.bf16.vlgmr.msra.gmra.mxu0 %vm541_vm3, %v1035_v27 }
 0x3ed   : > { %2098 = vmatpush3.bf16.msra.mxu0 %v1287_v45  ;;  %2099 = vmatprep.mubr.msk.bf16.mxu0 %vm2349_vm1, %v2348_v3 }
 0x3ee   : > { %2109 = vmatprep.subr.bf16.mxu0 %v2348_v3 }
 0x40a   : > { %v1006_v46 = vpop.xlane.xlu1 %1005 }
 0x40b   : > { %2247 = vrcp.f32 %v1006_v46 }
 0x40e   : > { %v1012_v47 = vpop.xlane.xlu1 %1011  ;;  %v1009_v48 = vpop.xlane.xlu0 %1008 }
 0x40f   : > { %2249 = vrcp.f32 %v1012_v47 }
 0x410   : > { %2251 = vrcp.f32 %v1009_v48 }
 0x412   : > { %v1015_v51 = vpop.xlane.xlu0 %1014  ;;  %v1378_v55 = vpop.permute.xlu1 %1377 }
 0x413   : > { %2253 = vrcp.f32 %v1015_v51  ;;  %v1383_v59 = vsel %vm1045_vm4, %v1378_v55, 0  ;;  %v1462_v55 = vlaneseq }
 0x416   : > { %v1330_v52 = vpop.permute.xlu0 %1329 }
 0x417   : > { %v1335_v49 = vsel %vm1045_vm4, %v1330_v52, 0 }
 0x418   : > { %v2248_v19 = vpop.eup %2247 }
 0x419   : > { %v1028_v23 = vmul.f32 %v2248_v19, %v2616_v26 }
 0x41b   : > { %v1036_v53 = vpack.c.bf16 %v1028_v23, %v1028_v23 }
 0x41c   : > { %v2250_v16 = vpop.eup %2249 }
 0x41d   : > { %v2252_v54 = vpop.eup %2251  ;;  %2094 = vmatmul.mubr.msk.bf16.vlgmr.msra.gmra.mxu1 %vm541_vm3, %v1036_v53  ;;  %v1030_v56 = vmul.f32 %v2250_v16, %v2622_v14 }
 0x41e   : > { %2104 = vmatpush3.bf16.msra.mxu1 %v1335_v49  ;;  %v1029_v50 = vmul.f32 %v2252_v54, %v2618_v22  ;;  %2105 = vmatprep.mubr.msk.bf16.mxu1 %vm2349_vm1, %v2348_v3 }
 0x41f   : > { %2115 = vmatprep.subr.bf16.mxu1 %v2348_v3  ;;  %v1038_v60 = vpack.c.bf16 %v1030_v56, %v1030_v56  ;;  %v2688_v56 = vshrl.u32 %v1462_v55, 7 }
 0x420   : > { %v1037_v57 = vpack.c.bf16 %v1029_v50, %v1029_v50  ;;  %v2254_v58 = vpop.eup %2253 }
 0x421   : > { %v1031_v61 = vmul.f32 %v2254_v58, %v2628_v21  ;;  %v2692_v58 = vld [vmem:[%s2485_s11] sm:$0x3f] }
 0x422   : > { %2100 = vmatmul.mubr.msk.bf16.vlgmr.msra.gmra.mxu0 %vm541_vm3, %v1037_v57  ;;  %v1464_v57 = vsub.s32 0, %v2688_v56 }
 0x423   : > { %2110 = vmatpush3.bf16.msra.mxu0 %v1383_v59  ;;  %2111 = vmatprep.mubr.msk.bf16.mxu0 %vm2349_vm1, %v2348_v3  ;;  %v1039_v62 = vpack.c.bf16 %v1031_v61, %v1031_v61 }
 0x424   : > { %2123 = vmatprep.subr.bf16.mxu0 %v2348_v3  ;;  %v1465_v59 = vrot.slane %v2692_v58, %v1464_v57 }
 0x425   : > { %2106 = vmatmul.mubr.msk.bf16.vlgmr.msra.gmra.mxu1 %vm541_vm3, %v1038_v60 }
 0x426   : > { %2119 = vmatprep.mubr.msk.bf16.mxu1 %vm2349_vm1, %v2348_v3  ;;  %2116 = vmatpush3.bf16.msra.mxu1 %v2215_v18  ;;  %v2219_v18 = vld [vmem:[%s2480_s24 + $0x18] sm:$0xff]  }
 0x427   : > { %2117 = vmatprep.subr.bf16.mxu1 %v2348_v3 }
 0x42a   : > { %2112 = vmatmul.mubr.msk.bf16.vlgmr.msra.gmra.mxu0 %vm541_vm3, %v1039_v62  ;;  %2118 = vmatpush3.bf16.msra.mxu1 %v2216_v25 }
 0x42b   : > { %2127 = vmatprep.mubr.msk.bf16.mxu0 %vm2349_vm1, %v2348_v3  ;;  %2131 = vmatprep.subr.bf16.mxu1 %v2348_v3 }
 0x454   : > { %v1083_v63 = vpop.f32.mrf.mxu1 }
 0x455   : > { %v1131_v0 = vpop.f32.mrf.mxu0 }
 0x456   : > { %v2071_v1 = vpop.f32.mrf.mxu1 }
 0x457   : > { %v2077_v2 = vpop.f32.mrf.mxu0 }
 0x458   : > { %v1086_v4 = vpop.f32.mrf.mxu1 }
 0x459   : > { %v1134_v7 = vpop.f32.mrf.mxu0 }
 0x45a   : > { %v2072_v8 = vpop.f32.mrf.mxu1 }
 0x45b   : > { %v2078_v9 = vpop.f32.mrf.mxu0 }
 0x4a8   : > { %v1179_v11 = vpop.f32.mrf.mxu1 }
 0x4aa   : > { %v2083_v12 = vpop.f32.mrf.mxu1 }
 0x4ac   : > { %v1182_v26 = vpop.f32.mrf.mxu1  ;;  %v1227_v13 = vpop.f32.mrf.mxu0 }
 0x4ad   : > { %v2198_v22 = vpack.i.bf16 %v1227_v13, %v1179_v11 }
 0x4ae   : > { %v2084_v10 = vpop.f32.mrf.mxu1  ;;  %v2089_v14 = vpop.f32.mrf.mxu0 }
 0x4af   : > { %2199 = vrot.lane.b32.xlu0 %v2198_v22, %s2355_s17 }
 0x4b0   : > { %v1230_v15 = vpop.f32.mrf.mxu0 }
 0x4b2   : > { %v2090_v17 = vpop.f32.mrf.mxu0 }
 0x4b3   : > { %v2218_v17 = vld [vmem:[%s2469_s15] sm:$0xff]  }
 0x4dd   : > { %v1275_v20 = vpop.f32.mrf.mxu1 }
 0x4df   : > { %v2095_v21 = vpop.f32.mrf.mxu1 }
 0x4e1   : > { %v1278_v24 = vpop.f32.mrf.mxu1 }
 0x4e2   : > { %v1323_v28 = vpop.f32.mrf.mxu0 }
 0x4e3   : > { %v2203_v29 = vpack.i.bf16 %v1323_v28, %v1275_v20  ;;  %v2096_v31 = vpop.f32.mrf.mxu1 }
 0x4e4   : > { %v2101_v32 = vpop.f32.mrf.mxu0  ;;  %v1553_v31 = vsub.s32 2, %v2688_v56 }
 0x4e5   : > { %2204 = vrot.lane.b32.xlu1 %v2203_v29, %s2356_s21  ;;  %v1371_v33 = vpop.f32.mrf.mxu1 }
 0x4e6   : > { %v1326_v34 = vpop.f32.mrf.mxu0 }
 0x4e7   : > { %v2107_v35 = vpop.f32.mrf.mxu1  ;;  %v1554_v34 = vrot.slane %v2692_v58, %v1553_v31 }
 0x4e8   : > { %v2102_v36 = vpop.f32.mrf.mxu0  ;;  %v1559_v35 = vsub.s32 3, %v2688_v56 }
 0x4e9   : > { %v1374_v37 = vpop.f32.mrf.mxu1 }
 0x4ea   : > { %v1419_v38 = vpop.f32.mrf.mxu0 }
 0x4eb   : > { %v2208_v30 = vpack.i.bf16 %v1419_v38, %v1371_v33  ;;  %v2108_v39 = vpop.f32.mrf.mxu1 }
 0x4ec   : > { %v2113_v40 = vpop.f32.mrf.mxu0 }
 0x4ed   : > { %2209 = vrot.lane.b32.xlu0 %v2208_v30, %s2357_s22  ;;  %v1560_v30 = vrot.slane %v2692_v58, %v1559_v35 }
 0x4ee   : > { %v1422_v41 = vpop.f32.mrf.mxu0 }
 0x4f0   : > { %v2114_v42 = vpop.f32.mrf.mxu0 }
 0x521   : > { %v2200_v43 = vpop.permute.xlu0 %2199 }
 0x522   : > { %v2202_v27 = vunpack.i.h.bf16 %v2200_v43  ;;  %v2201_v45 = vunpack.i.l.bf16 %v2200_v43  ;;  %v2220_v43 = vld [vmem:[%s2480_s24 + $0x10] sm:$0xff]  }
 0x524   : > { %v1450_v51 = vsel %vm541_vm3, %v1131_v0, %v2202_v27  ;;  %v1449_v19 = vsel %vm541_vm3, %v1083_v63, %v2201_v45  ;;  %v2222_v27 = vld [vmem:[%s2480_s24] sm:$0xff]  }
 0x525   : > { %v1946_v45 = vld [vmem:[%s428_s18] ss:$0 sm:$0xff]  ;;  %s1766_s18 = sshll.u32 %s2358_s19, 4  ;;  %s1767_s18 = int_to_ptr.vmem [resolvable:$true] %s1766_s18 }
 0x526   : > { %s2289_s10 = scalar_lea.vmem %s1767_s18, 256  ;;  %p2296_p7 = scmp.lt.s32.totalorder %s1767_s18, %s1767_s18 }
 0x527   : > { %p2290_p4 = scmp.ne.s32.totalorder %s1767_s18, %s2289_s10  ;;  %p2297_p8 = scmp.lt.s32.totalorder %s2289_s10, %s2289_s10 }
 0x529   : > { %p2298_p9 = por %p2297_p8, %p2296_p7 }
 0x557   : > { %v2205_v44 = vpop.permute.xlu1 %2204 }
 0x558   : > { %v2207_v46 = vunpack.i.h.bf16 %v2205_v44  ;;  %v2206_v47 = vunpack.i.l.bf16 %v2205_v44  ;;  %v2221_v44 = vld [vmem:[%s2480_s24 + $0x8] sm:$0xff]   ;;  %s2773_s24 = sadd.s32 4294967295, %s2343_s29  }
 0x559   : > { %p2734_p3 = scmp.eq.s32.totalorder %s2773_s24, 1 }
 0x55a   : > { %v1453_v53 = vsel %vm1451_vm5, %v1450_v51, %v2207_v46  ;;  %v1452_v16 = vsel %vm1451_vm5, %v1449_v19, %v2206_v47 }
 0x55b   : > { %p2291_p5 = pnand %p2290_p4, %p2734_p3 }
 0x55d   : > { %p2292_p6 = pneg %p2291_p5 }
 0x55f   : > { %v2210_v48 = vpop.permute.xlu0 %2209  ;;  %p2299_p10 = pnand %p2298_p9, %p2292_p6 }
 0x560   : > { %v2212_v23 = vunpack.i.h.bf16 %v2210_v48  ;;  %v2211_v52 = vunpack.i.l.bf16 %v2210_v48 }
 0x562   : > { %v1456_v54 = vsel %vm1454_vm6, %v1453_v53, %v2212_v23  ;;  %v1455_v49 = vsel %vm1454_vm6, %v1452_v16, %v2211_v52 }
 0x563   : > { %v1457_v50 = vpack.c.bf16 %v1456_v54, %v1455_v49 }
 0x565   : > { %2120 = vmatmul.mubr.msk.bf16.vlgmr.msra.gmra.mxu1 %vm476_vm2, %v1457_v50 }
 0x566   : > { %2139 = vmatprep.mubr.msk.bf16.mxu1 %vm2349_vm1, %v2348_v3  ;;  %2132 = vmatpush3.bf16.msra.mxu1 %v2219_v18  ;;  %v1751_v18 = vsub.s32 5, %v2688_v56 }
 0x567   : > { %2133 = vmatprep.subr.bf16.mxu1 %v2348_v3 }
 0x56a   : > { %2134 = vmatpush3.bf16.msra.mxu1 %v2220_v43 }
 0x56b   : > { %2135 = vmatprep.subr.bf16.mxu1 %v2348_v3 }
 0x56e   : > { %2136 = vmatpush3.bf16.msra.mxu1 %v2221_v44 }
 0x56f   : > { %2137 = vmatprep.subr.bf16.mxu1 %v2348_v3 }
 0x572   : > { %2138 = vmatpush3.bf16.msra.mxu1 %v2222_v27 }
 0x625   : > { %v1515_v60 = vpop.f32.mrf.mxu1 }
 0x626   : > { %v1516_v61 = vadd.f32 %v1515_v60, %v1465_v59 }
 0x627   : > { %v2121_v62 = vpop.f32.mrf.mxu1 }
 0x628   : > { %v1522_v63 = vadd.f32 %v1516_v61, %v2492_v5 }
 0x629   : > { %v1518_v0 = vpop.f32.mrf.mxu1 }
 0x62a   : > { %v1519_v1 = vadd.f32 %v1518_v0, %v1465_v59  ;;  %v1524_v2 = vsel %vm476_vm2, %v1522_v63, 0.0 }
 0x62b   : > { %1525 = vadd.xlane.f32.xlu1 %v1524_v2  ;;  %v2122_v4 = vpop.f32.mrf.mxu1 }
 0x62c   : > { %v1523_v7 = vadd.f32 %v1519_v1, %v2494_v6  ;;  %v2217_v6 = vld [vmem:[%s2469_s15 + $0x8] sm:$0xff]  }
 0x62d   : > { %2124 = vmatpush3.bf16.msra.mxu0 %v2217_v6 }
 0x62e   : > { %v1527_v8 = vsel %vm476_vm2, %v1523_v7, 0.0  ;;  %2125 = vmatprep.subr.bf16.mxu0 %v2348_v3  ;;  %v1644_v3 = vsub.s32 1, %v2688_v56 }
 0x62f   : > { %1528 = vadd.xlane.f32.xlu0 %v1527_v8 }
 0x630   : > { %v1645_v54 = vrot.slane %v2692_v58, %v1644_v3 }
 0x631   : > { %2126 = vmatpush3.bf16.msra.mxu0 %v2218_v17  ;;  %v1745_v17 = vsub.s32 4, %v2688_v56 }
 0x6b4   : > { %v1526_v9 = vpop.xlane.xlu1 %1525 }
 0x6b5   : > { %v1531_v11 = vmul.f32 0.03125, %v1526_v9 }
 0x6b7   : > { %v1533_v12 = vsub.f32 %v1522_v63, %v1531_v11 }
 0x6b8   : > { %v1529_v26 = vpop.xlane.xlu0 %1528 }
 0x6b9   : > { %v1532_v13 = vmul.f32 0.03125, %v1529_v26  ;;  %v1535_v5 = vmul.f32 %v1533_v12, %v1533_v12 }
 0x6bb   : > { %v1534_v22 = vsub.f32 %v1523_v7, %v1532_v13  ;;  %v1537_v10 = vsel %vm476_vm2, %v1535_v5, 0.0 }
 0x6bc   : > { %1538 = vadd.xlane.f32.xlu0 %v1537_v10 }
 0x6bd   : > { %v1536_v14 = vmul.f32 %v1534_v22, %v1534_v22 }
 0x6bf   : > { %v1540_v15 = vsel %vm476_vm2, %v1536_v14, 0.0 }
 0x6c0   : > { %1541 = vadd.xlane.f32.xlu1 %v1540_v15 }
 0x745   : > { %v1539_v20 = vpop.xlane.xlu0 %1538 }
 0x746   : > { %v1543_v21 = vmul.f32 0.03125, %v1539_v20  ;;  %v1746_v20 = vrot.slane %v2692_v58, %v1745_v17 }
 0x748   : > { %v1545_v24 = vadd.f32 1e-05, %v1543_v21 }
 0x749   : > { %v1542_v25 = vpop.xlane.xlu1 %1541 }
 0x74a   : > { %2255 = vrsqrt.f32 %v1545_v24  ;;  %v1544_v28 = vmul.f32 0.03125, %v1542_v25  ;;  %v1752_v25 = vrot.slane %v2692_v58, %v1751_v18 }
 0x74c   : > { %v1546_v29 = vadd.f32 1e-05, %v1544_v28 }
 0x74e   : > { %2257 = vrsqrt.f32 %v1546_v29 }
 0x757   : > { %v2256_v32 = vpop.eup %2255 }
 0x758   : > { %v1549_v33 = vmul.f32 %v2256_v32, %v1533_v12 }
 0x75a   : > { %v1555_v38 = vmul.f32 %v1554_v34, %v1549_v33 }
 0x75b   : > { %v2258_v36 = vpop.eup %2257 }
 0x75c   : > { %v1550_v37 = vmul.f32 %v2258_v36, %v1534_v22  ;;  %v1561_v40 = vadd.f32 %v1560_v30, %v1555_v38 }
 0x75e   : > { %v1556_v39 = vmul.f32 %v1554_v34, %v1550_v37 }
 0x760   : > { %v1562_v41 = vadd.f32 %v1560_v30, %v1556_v39 }
 0x762   : > { %v1563_v42 = vpack.c.bf16 %v1562_v41, %v1561_v40 }
 0x764   : > { %2128 = vmatmul.mubr.msk.bf16.vlgmr.msra.gmra.mxu0 %vm476_vm2, %v1563_v42 }
 0x824   : > { %v1624_v46 = vpop.f32.mrf.mxu0 }
 0x825   : > { %v1625_v48 = vadd.f32 %v1946_v45, %v1624_v46 }
 0x826   : > { %v2129_v47 = vpop.f32.mrf.mxu0 }
 0x827   : > { %v1631_v52 = vmax.f32 %v1625_v48, 0.0 }
 0x828   : > { %v1627_v51 = vpop.f32.mrf.mxu0 }
 0x829   : > { %v1628_v19 = vadd.f32 %v1946_v45, %v1627_v51 }
 0x82a   : > { %v2130_v23 = vpop.f32.mrf.mxu0 }
 0x82b   : > { %v1632_v53 = vmax.f32 %v1628_v19, 0.0 }
 0x82d   : > { %v1633_v16 = vpack.c.bf16 %v1632_v53, %v1631_v52 }
 0x82f   : > { %2140 = vmatmul.mubr.msk.bf16.vlgmr.msra.gmra.mxu1 %vm1670_vm7, %v1633_v16 }
 0x8ef   : > { %v1708_v49 = vpop.f32.mrf.mxu1 }
 0x8f0   : > { %v1709_v50 = vadd.f32 %v1708_v49, %v1645_v54 }
 0x8f1   : > { %v2141_v55 = vpop.f32.mrf.mxu1 }
 0x8f2   : > { %v1715_v57 = vadd.f32 %v1709_v50, %v1561_v40 }
 0x8f3   : > { %v1711_v59 = vpop.f32.mrf.mxu1 }
 0x8f4   : > { %v1712_v60 = vadd.f32 %v1711_v59, %v1645_v54  ;;  %v1717_v61 = vsel %vm476_vm2, %v1715_v57, 0.0 }
 0x8f5   : > { %1718 = vadd.xlane.f32.xlu0 %v1717_v61  ;;  %v2142_v62 = vpop.f32.mrf.mxu1 }
 0x8f6   : > { %v1716_v63 = vadd.f32 %v1712_v60, %v1562_v41 }
 0x8f8   : > { %v1720_v0 = vsel %vm476_vm2, %v1716_v63, 0.0 }
 0x8f9   : > { %1721 = vadd.xlane.f32.xlu1 %v1720_v0 }
 0x97e   : > { %v1719_v1 = vpop.xlane.xlu0 %1718 }
 0x97f   : > { %v1723_v2 = vmul.f32 0.03125, %v1719_v1 }
 0x981   : > { %v1725_v4 = vsub.f32 %v1715_v57, %v1723_v2 }
 0x982   : > { %v1722_v7 = vpop.xlane.xlu1 %1721 }
 0x983   : > { %v1724_v8 = vmul.f32 0.03125, %v1722_v7  ;;  %v1727_v9 = vmul.f32 %v1725_v4, %v1725_v4 }
 0x985   : > { %v1726_v11 = vsub.f32 %v1716_v63, %v1724_v8  ;;  %v1729_v12 = vsel %vm476_vm2, %v1727_v9, 0.0 }
 0x986   : > { %1730 = vadd.xlane.f32.xlu0 %v1729_v12 }
 0x987   : > { %v1728_v26 = vmul.f32 %v1726_v11, %v1726_v11 }
 0x989   : > { %v1732_v13 = vsel %vm476_vm2, %v1728_v26, 0.0 }
 0x98a   : > { %1733 = vadd.xlane.f32.xlu1 %v1732_v13 }
 0xa0f   : > { %v1731_v5 = vpop.xlane.xlu0 %1730 }
 0xa10   : > { %v1735_v22 = vmul.f32 0.03125, %v1731_v5 }
 0xa12   : > { %v1737_v10 = vadd.f32 1e-05, %v1735_v22 }
 0xa13   : > { %v1734_v14 = vpop.xlane.xlu1 %1733 }
 0xa14   : > { %2259 = vrsqrt.f32 %v1737_v10  ;;  %v1736_v15 = vmul.f32 0.03125, %v1734_v14 }
 0xa16   : > { %v1738_v6 = vadd.f32 1e-05, %v1736_v15 }
 0xa18   : > { %2261 = vrsqrt.f32 %v1738_v6 }
 0xa21   : > { %v2260_v21 = vpop.eup %2259 }
 0xa22   : > { %v1741_v24 = vmul.f32 %v2260_v21, %v1725_v4 }
 0xa24   : > { %v1747_v28 = vmul.f32 %v1746_v20, %v1741_v24 }
 0xa25   : > { %v2262_v29 = vpop.eup %2261 }
 0xa26   : > { %v1742_v31 = vmul.f32 %v2262_v29, %v1726_v11  ;;  %v1753_v32 = vadd.f32 %v1752_v25, %v1747_v28 }
 0xa28   : > { %v1748_v33 = vmul.f32 %v1746_v20, %v1742_v31  ;;  %1755 = vst.msk [vmem:[#allocation5] sm:$0xff] %vm476_vm2, %v1753_v32 }
 0xa2a   : > { %v1754_v56 = vadd.f32 %v1752_v25, %v1748_v33 }
 0xa2c   : > { %1756 = vst.msk [vmem:[#allocation5 + $0x8] sm:$0xff] %vm476_vm2, %v1754_v56 }
 0xa2d   : > { %2302 = shalt.err (!%p2299_p10)
}
 0xa2e   : > { %s2359_s11 = smov 128  }
 0xa2f   : > { %2148 = dma.vmem_to_hbm [thread:$0]  (%p2734_p3), %s1767_s18, 256, %s2768_s8, [#allocation4], %s2359_s11, %s2359_s11, %s2355_s17  }
 0xa30   : > { %2330 = dma.done.wait (%p2734_p3), [#allocation4], 256  }
 0xa31   : > { %2332 = vsyncadd (%p2734_p3), [#allocation4], 4294967040 }
 0xa32 PF: > { %s20_s29 = sadd.s32 1, %s2343_s29   ;;  %s2775_s27 = smov %s2339_s28 }
 0xa33   : > { %p17_p11 = scmp.ge.s32.totalorder %s20_s29, 4   ;;  %s2776_s28 = smov %s2778_s9 }
 0xa35   :  { %19 = sbr.rel (!%p17_p11) target bundleno = 3 (0x3), region = 108 }
 0xa3a   :  { %1782 = vsyncpa [#allocation3], 1 }
 0xa3b   :  { %1784 = vsyncpa [#allocation3 + $0x1], 1 }
 0xa3c   :  { %1785 = vsyncpa [#allocation4], 1 }
 0xa3d   :  { %1787 = vsyncpa [#allocation4 + $0x1], 1 }

</bundles_post_ra>
